<compile_context>
chip_gen: v6e
topology: v6e:2x2x1
jax: 0.10.0
libtpu: 0.0.40
codegen_flags: <defaults>
</compile_context>

<pallas_src>
import jax
import jax.numpy as jnp
from jax import lax
from jax.experimental import pallas as pl
from jax.experimental.pallas import tpu as pltpu

EPS = 1e-5


def _round_up(x, m):
    return ((x + m - 1) // m) * m


def _vmem_budget_bytes():
    # Per-generation scoped-VMEM budget: ~75% of physical, capped at 96 MiB.
    #   v5e / v6e (128 MiB physical) -> 96 MiB ;  v7x (64 MiB) -> 48 MiB.
    try:
        cap = pltpu.get_tpu_info().vmem_capacity_bytes
    except Exception:
        cap = 64 * 1024 * 1024
    return min(96 * 1024 * 1024, (cap * 3) // 4)


# ---------------------------------------------------------------------------
# Pass A: per-input-channel statistics, accumulated in the VMEM-resident output
# blocks (constant index over the inner M axis), one partial accumulator per
# leading "parallel" grid index (v7x: one per TensorCore).
#   xsum  (P, 8, cin_p)      : rows all hold sum_m x[m, :]   (row 0 used downstream)
#   xgram (P, cin_p, cin_p)  : partial x^T x
# ---------------------------------------------------------------------------
def _stats_kernel(x_ref, sum_ref, gram_ref):
    @pl.when(pl.program_id(1) == 0)
    def _init():
        sum_ref[...] = jnp.zeros_like(sum_ref)
        gram_ref[...] = jnp.zeros_like(gram_ref)

    xb = x_ref[...]  # (tm, cin_p) in compute dtype (bf16 by default)
    sum_ref[...] += jnp.sum(xb.astype(jnp.float32), axis=0, keepdims=True)
    # Contract over rows natively on the MXU (no transposed operand materialized);
    # operands stay in the compute dtype, accumulation is f32.
    gram_ref[...] += lax.dot_general(
        xb, xb, dimension_numbers=(((0,), (0,)), ((), ())),
        preferred_element_type=jnp.float32)


# ---------------------------------------------------------------------------
# Pass B: out = x @ W_folded + shift   (BN already folded into W_folded / shift)
# ---------------------------------------------------------------------------
def _matmul_affine_kernel(x_ref, w_ref, b_ref, o_ref):
    y = jnp.dot(x_ref[...], w_ref[...], preferred_element_type=jnp.float32)
    o_ref[...] = (y + b_ref[...]).astype(o_ref.dtype)


def downsample_conv(x_nchw, conv_weight, bn_gamma, bn_beta, *, compute_dtype=None):
    """DownsampleConv forward: 1x1 stride-2 Conv2d (bias=False) -> BatchNorm2d with
    training-mode batch statistics (eps=1e-5).

    x_nchw: (N, Cin, H, W); conv_weight: (Cout, Cin, 1, 1) (PyTorch layout).
    Returns (N, Cout, Ho, Wo) in x's dtype.  compute_dtype sets the MXU operand
    dtype (default bf16; pass jnp.float32 to force full precision)."""
    if compute_dtype is None:
        compute_dtype = jnp.bfloat16  # no native f32 MXU path on v5e/v6e

    N, Cin, H, W = x_nchw.shape
    Cout = conv_weight.shape[0]
    Ho, Wo = (H + 1) // 2, (W + 1) // 2
    M = N * Ho * Wo

    cin_p = _round_up(Cin, 128)
    cout_p = _round_up(Cout, 128)
    isz = jnp.dtype(compute_dtype).itemsize
    out_dtype = x_nchw.dtype
    out_isz = jnp.dtype(out_dtype).itemsize
    budget = _vmem_budget_bytes()

    # ---- Tile selection (generation-aware via the VMEM budget) ------------------
    tm_full = _round_up(M, 8)
    tm_list = [t for t in (1024, 512, 256, 128) if t <= tm_full] or [tm_full]
    # Prefer a full-width Cout tile first: with tn == cout_p, x is streamed from HBM
    # exactly once in Pass B (no per-output-column-tile re-reads).
    tn_list = [cout_p] + [t for t in (512, 256, 128) if t < cout_p and cout_p % t == 0]

    def fits(tm_c, tn_c):
        a_bytes = (2 * tm_c * cin_p * isz            # x double-buffer (Pass A)
                   + 2 * cin_p * cin_p * 4           # gram block
                   + 2 * 8 * cin_p * 4)              # sum block
        b_bytes = (2 * (tm_c * cin_p + cin_p * tn_c + tn_c) * isz   # x, W, shift buffers
                   + 2 * tm_c * tn_c * out_isz                      # output double-buffer
                   + tm_c * tn_c * 4)                               # f32 matmul temp
        return max(a_bytes, b_bytes) <= budget

    tm, tn = tm_list[-1], tn_list[-1]
    _done = False
    for cand_tn in tn_list:
        for cand_tm in tm_list:
            if fits(cand_tm, cand_tn):
                tm, tn, _done = cand_tm, cand_tn, True
                break
        if _done:
            break

    num_m_total = pl.cdiv(M, tm)
    n_split = 2 if num_m_total >= 2 else 1          # shard Pass A over both v7x TCs
    num_m_inner = pl.cdiv(num_m_total, n_split)
    m_p = n_split * num_m_inner * tm
    num_m = m_p // tm
    num_n = cout_p // tn

    # ---- XLA glue: stride-2 subsample + NCHW -> (M, Cin) rows, zero padding -----
    # TODO(synk): fuse the stride-2 NCHW gather + channel-to-lane transpose into the
    # kernel DMA path (manual make_async_copy from a pl.ANY HBM ref, or accept NHWC
    # input upstream); today XLA materializes x_mat once (compute dtype, quarter-size).
    xs = x_nchw[:, :, ::2, ::2].astype(compute_dtype)
    x_mat = jnp.transpose(xs, (0, 2, 3, 1)).reshape(M, Cin)
    x_mat = jnp.pad(x_mat, ((0, m_p - M), (0, cin_p - Cin)))

    w_mat = jnp.transpose(conv_weight.reshape(Cout, Cin), (1, 0)).astype(jnp.float32)
    w_mat = jnp.pad(w_mat, ((0, cin_p - Cin), (0, cout_p - Cout)))
    gamma = jnp.pad(bn_gamma.astype(jnp.float32), (0, cout_p - Cout))
    beta = jnp.pad(bn_beta.astype(jnp.float32), (0, cout_p - Cout))

    # ---- Pass A: x statistics (parallel leading axis, M accumulation inner) -----
    xsum, xgram = pl.pallas_call(
        _stats_kernel,
        out_shape=(jax.ShapeDtypeStruct((n_split, 8, cin_p), jnp.float32),
                   jax.ShapeDtypeStruct((n_split, cin_p, cin_p), jnp.float32)),
        grid=(n_split, num_m_inner),
        in_specs=[pl.BlockSpec((tm, cin_p),
                               lambda p, i: (p * num_m_inner + i, 0))],
        out_specs=(pl.BlockSpec((None, 8, cin_p), lambda p, i: (p, 0, 0)),
                   pl.BlockSpec((None, cin_p, cin_p), lambda p, i: (p, 0, 0))),
        compiler_params=pltpu.CompilerParams(
            dimension_semantics=("parallel", "arbitrary"),
            vmem_limit_bytes=budget),
        cost_estimate=pl.CostEstimate(
            flops=2 * m_p * cin_p * cin_p,
            transcendentals=0,
            bytes_accessed=m_p * cin_p * isz
                           + n_split * (cin_p * cin_p + 8 * cin_p) * 4),
    )(x_mat)

    # ---- Tiny O(Cin*Cout) glue: fold BN (biased batch stats, eps) into the weight.
    sum_x = jnp.sum(xsum[:, 0, :], axis=0)                  # (cin_p,)
    gram = jnp.sum(xgram, axis=0)                           # (cin_p, cin_p)
    mean_x = sum_x / M
    cov_x = gram / M - jnp.outer(mean_x, mean_x)            # centered (numerically stable)
    mean_y = mean_x @ w_mat                                 # (cout_p,)
    var_y = jnp.maximum(jnp.sum((cov_x @ w_mat) * w_mat, axis=0), 0.0)
    scale = gamma * lax.rsqrt(var_y + EPS)
    w_fold = (w_mat * scale[None, :]).astype(compute_dtype)  # (cin_p, cout_p)
    shift = (beta - mean_y * scale).reshape(1, cout_p).astype(jnp.float32)

    # ---- Pass B: single tiled matmul + affine -> final output (lane-dense stores).
    # Grid is (M, N) with M OUTERMOST: the (tm, cin_p) x tile stays VMEM-resident
    # across the inner Cout-tile loop, so x is read from HBM exactly once even when
    # num_n > 1; with the preferred tn == cout_p, num_n == 1 and W is fetched once.
    out_mat = pl.pallas_call(
        _matmul_affine_kernel,
        out_shape=jax.ShapeDtypeStruct((m_p, cout_p), out_dtype),
        grid=(num_m, num_n),
        in_specs=[pl.BlockSpec((tm, cin_p), lambda i, j: (i, 0)),
                  pl.BlockSpec((cin_p, tn), lambda i, j: (0, j)),
                  pl.BlockSpec((1, tn), lambda i, j: (0, j))],
        out_specs=pl.BlockSpec((tm, tn), lambda i, j: (i, j)),
        compiler_params=pltpu.CompilerParams(
            dimension_semantics=("parallel", "parallel"),    # v7x: shard over both TCs
            vmem_limit_bytes=budget),
        cost_estimate=pl.CostEstimate(
            flops=2 * m_p * cin_p * cout_p,
            transcendentals=0,
            bytes_accessed=(m_p * cin_p * isz
                            + (num_m if num_n > 1 else 1) * cin_p * cout_p * isz
                            + m_p * cout_p * out_isz)),
    )(x_mat, w_fold, shift)

    # TODO(synk): if the consumer accepts NHWC, return out_mat[:M,:Cout].reshape(N,Ho,Wo,Cout)
    # directly and skip this final full-HBM-round-trip transpose back to NCHW.
    out = out_mat[:M, :Cout].reshape(N, Ho, Wo, Cout)
    return jnp.transpose(out, (0, 3, 1, 2))


def _reference(x_nchw, conv_weight, bn_gamma, bn_beta):
    # Pure-JAX reference: stride-2 1x1 conv + training-mode BatchNorm forward.
    y = lax.conv_general_dilated(
        x_nchw.astype(jnp.float32), conv_weight.astype(jnp.float32),
        window_strides=(2, 2), padding="VALID",
        dimension_numbers=("NCHW", "OIHW", "NCHW"))
    mean = jnp.mean(y, axis=(0, 2, 3), keepdims=True)
    var = jnp.mean((y - mean) ** 2, axis=(0, 2, 3), keepdims=True)
    g = bn_gamma.reshape(1, -1, 1, 1)
    b = bn_beta.reshape(1, -1, 1, 1)
    return (y - mean) * lax.rsqrt(var + EPS) * g + b


if __name__ == "__main__":
    key = jax.random.PRNGKey(0)
    kx, kw, kg, kb = jax.random.split(key, 4)

    N, inplanes, planes, H, W = 2, 4, 8, 16, 16
    x = jax.random.normal(kx, (N, inplanes, H, W), dtype=jnp.float32)

    # PyTorch-shaped parameters: conv weight (planes, inplanes, 1, 1); BN affine params.
    fan_in = inplanes  # kernel_size = 1
    w = jax.random.normal(kw, (planes, inplanes, 1, 1), dtype=jnp.float32) * (2.0 / fan_in) ** 0.5
    gamma = 0.5 + jax.random.uniform(kg, (planes,), dtype=jnp.float32)
    beta = 0.1 * jax.random.normal(kb, (planes,), dtype=jnp.float32)

    ref = _reference(x, w, gamma, beta)

    # Full-precision compute path: tight tolerance against the reference.
    out32 = jax.block_until_ready(downsample_conv(x, w, gamma, beta, compute_dtype=jnp.float32))
    assert out32.shape == (N, planes, H // 2, W // 2), out32.shape
    err32 = float(jnp.max(jnp.abs(out32 - ref)))
    assert jnp.allclose(out32, ref, atol=1e-4, rtol=1e-4), err32

    # Default path (bf16 MXU operands, f32 accumulation): bf16-level tolerance.
    outbf = jax.block_until_ready(downsample_conv(x, w, gamma, beta))
    errbf = float(jnp.max(jnp.abs(outbf - ref)))
    assert jnp.allclose(outbf, ref, atol=1.5e-1, rtol=5e-2), errbf

    print("KERNEL_OK")
</pallas_src>

<mosaic_0001>
module attributes {stable_mosaic.version = 11 : i64} {
  func.func @_stats_kernel(%arg0: i32, %arg1: i32, %arg2: memref<128x128xf32, #tpu.memory_space<vmem>>, %arg3: memref<1x8x128xf32, #tpu.memory_space<vmem>>, %arg4: memref<1x128x128xf32, #tpu.memory_space<vmem>>) attributes {dimension_semantics = [#tpu.dimension_semantics<parallel>, #tpu.dimension_semantics<arbitrary>], iteration_bounds = array<i64: 1, 1>, scalar_prefetch = 0 : i64, scratch_operands = 0 : i64, tpu.core_type = #tpu.core_type<tc>, window_params = [{transform_indices = @transform_0, window_bounds = array<i64: 128, 128>}, {transform_indices = @transform_1, window_bounds = array<i64: 1, 8, 128>}, {transform_indices = @transform_2, window_bounds = array<i64: 1, 128, 128>}]} {
    %c0_i32 = arith.constant 0 : i32
    %0 = arith.cmpi eq, %arg1, %c0_i32 : i32
    %1 = arith.extui %0 : i1 to i32
    %c0_i32_0 = arith.constant 0 : i32
    %2 = arith.cmpi ne, %1, %c0_i32_0 : i32
    scf.if %2 {
      %cst_15 = arith.constant 0.000000e+00 : f32
      %20 = vector.broadcast %cst_15 : f32 to vector<8x128xf32>
      %c0_16 = arith.constant 0 : index
      %c0_17 = arith.constant 0 : index
      %c0_18 = arith.constant 0 : index
      %21 = vector.load %arg3[%c0_16, %c0_17, %c0_18] : memref<1x8x128xf32, #tpu.memory_space<vmem>>, vector<1x8x128xf32>
      %22 = vector.shape_cast %21 : vector<1x8x128xf32> to vector<8x128xf32>
      %23 = vector.shape_cast %20 : vector<8x128xf32> to vector<1x8x128xf32>
      tpu.vector_store %arg3[%c0_16, %c0_17, %c0_18], %23 {strides = array<i32>} : memref<1x8x128xf32, #tpu.memory_space<vmem>>, vector<1x8x128xf32>,
      %cst_19 = arith.constant 0.000000e+00 : f32
      %24 = vector.broadcast %cst_19 : f32 to vector<128x128xf32>
      %c0_20 = arith.constant 0 : index
      %c0_21 = arith.constant 0 : index
      %c0_22 = arith.constant 0 : index
      %25 = vector.load %arg4[%c0_20, %c0_21, %c0_22] : memref<1x128x128xf32, #tpu.memory_space<vmem>>, vector<1x128x128xf32>
      %26 = vector.shape_cast %25 : vector<1x128x128xf32> to vector<128x128xf32>
      %27 = vector.shape_cast %24 : vector<128x128xf32> to vector<1x128x128xf32>
      tpu.vector_store %arg4[%c0_20, %c0_21, %c0_22], %27 {strides = array<i32>} : memref<1x128x128xf32, #tpu.memory_space<vmem>>, vector<1x128x128xf32>,
    } else {
    }
    %c0 = arith.constant 0 : index
    %c0_1 = arith.constant 0 : index
    %3 = vector.load %arg2[%c0, %c0_1] : memref<128x128xf32, #tpu.memory_space<vmem>>, vector<128x128xf32>
    %c0_2 = arith.constant 0 : index
    %c0_3 = arith.constant 0 : index
    %c0_4 = arith.constant 0 : index
    %4 = vector.load %arg3[%c0_2, %c0_3, %c0_4] : memref<1x8x128xf32, #tpu.memory_space<vmem>>, vector<1x8x128xf32>
    %5 = vector.shape_cast %4 : vector<1x8x128xf32> to vector<8x128xf32>
    %cst = arith.constant dense<0.000000e+00> : vector<128xf32>
    %6 = vector.multi_reduction <add>, %3, %cst [0] : vector<128x128xf32> to vector<128xf32>
    %7 = vector.shape_cast %6 : vector<128xf32> to vector<1x128xf32>
    %8 = vector.broadcast %7 : vector<1x128xf32> to vector<8x128xf32>
    %9 = arith.addf %5, %8 : vector<8x128xf32>
    %c0_5 = arith.constant 0 : index
    %c0_6 = arith.constant 0 : index
    %c0_7 = arith.constant 0 : index
    %10 = vector.load %arg3[%c0_5, %c0_6, %c0_7] : memref<1x8x128xf32, #tpu.memory_space<vmem>>, vector<1x8x128xf32>
    %11 = vector.shape_cast %10 : vector<1x8x128xf32> to vector<8x128xf32>
    %12 = vector.shape_cast %9 : vector<8x128xf32> to vector<1x8x128xf32>
    tpu.vector_store %arg3[%c0_5, %c0_6, %c0_7], %12 {strides = array<i32>} : memref<1x8x128xf32, #tpu.memory_space<vmem>>, vector<1x8x128xf32>,
    %c0_8 = arith.constant 0 : index
    %c0_9 = arith.constant 0 : index
    %c0_10 = arith.constant 0 : index
    %13 = vector.load %arg4[%c0_8, %c0_9, %c0_10] : memref<1x128x128xf32, #tpu.memory_space<vmem>>, vector<1x128x128xf32>
    %14 = vector.shape_cast %13 : vector<1x128x128xf32> to vector<128x128xf32>
    %cst_11 = arith.constant dense<0.000000e+00> : vector<128x128xf32>
    %15 = tpu.matmul %3, %3, %cst_11 {dimension_numbers = #tpu.dot_dimension_numbers<[0], [0], [1], [1], [0, 1, 1, 1], [], []>} : vector<128x128xf32>, vector<128x128xf32>, vector<128x128xf32> -> vector<128x128xf32>
    %16 = arith.addf %14, %15 : vector<128x128xf32>
    %c0_12 = arith.constant 0 : index
    %c0_13 = arith.constant 0 : index
    %c0_14 = arith.constant 0 : index
    %17 = vector.load %arg4[%c0_12, %c0_13, %c0_14] : memref<1x128x128xf32, #tpu.memory_space<vmem>>, vector<1x128x128xf32>
    %18 = vector.shape_cast %17 : vector<1x128x128xf32> to vector<128x128xf32>
    %19 = vector.shape_cast %16 : vector<128x128xf32> to vector<1x128x128xf32>
    tpu.vector_store %arg4[%c0_12, %c0_13, %c0_14], %19 {strides = array<i32>} : memref<1x128x128xf32, #tpu.memory_space<vmem>>, vector<1x128x128xf32>,
    return
  }
  func.func @transform_0(%arg0: i32, %arg1: i32) -> (i32, i32) {
    %c1_i32 = arith.constant 1 : i32
    %0 = arith.muli %arg0, %c1_i32 : i32
    %1 = arith.addi %0, %arg1 : i32
    %c0_i32 = arith.constant 0 : i32
    %c0_i32_0 = arith.constant 0 : i32
    return %1, %c0_i32 : i32, i32
  }
  func.func @transform_1(%arg0: i32, %arg1: i32) -> (i32, i32, i32) {
    %c0_i32 = arith.constant 0 : i32
    %c0_i32_0 = arith.constant 0 : i32
    %c0_i32_1 = arith.constant 0 : i32
    return %arg0, %c0_i32, %c0_i32_0 : i32, i32, i32
  }
  func.func @transform_2(%arg0: i32, %arg1: i32) -> (i32, i32, i32) {
    %c0_i32 = arith.constant 0 : i32
    %c0_i32_0 = arith.constant 0 : i32
    %c0_i32_1 = arith.constant 0 : i32
    return %arg0, %c0_i32, %c0_i32_0 : i32, i32, i32
  }
}

</mosaic_0001>

<bundles_post_ra>
// kernel: tpu_custom_call.1
= control target key start
LH: loop header
LB: loop body
LE: loop exit
PB: predicated region body
PF: predicated region fallthrough
CT: control target
= control target key end

     0   :  { %8 = vsyncpa [#allocation3], 0  ;;  %s667_s0 = inlined_call_operand.hbm [shape: f32[128,128], index: 0, kind: input, shape index: {}]   ;;  %s668_s1 = inlined_call_operand.hbm [shape: f32[1,8,128], index: 1, kind: output, shape index: {0}]   ;;  %s669_s2 = inlined_call_operand.hbm [shape: f32[1,128,128], index: 2, kind: output, shape index: {1}]  }
   0x1   :  { %9 = vsyncpa [#allocation4], 0 }
   0x2   :  { %10 = vsyncpa [#allocation7], 0  ;;  %s541_s9 = smov [#allocation2]  }
   0x3   :  { %s20_s10 = sshll.u32 %s541_s9, 4  ;;  %s21_s10 = int_to_ptr.vmem [resolvable:$true] %s20_s10 }
   0x4   :  { %s483_s11 = scalar_lea.vmem %s21_s10, 2048  ;;  %p488_p1 = scmp.lt.s32.totalorder %s21_s10, %s21_s10 }
   0x5   :  { %p484_p0 = scmp.ne.s32.totalorder %s21_s10, %s483_s11  ;;  %p489_p2 = scmp.lt.s32.totalorder %s483_s11, %s483_s11 }
   0x7   :  { %p490_p3 = por %p489_p2, %p488_p1 }
   0x9   :  { %p491_p4 = pnand %p490_p3, %p484_p0 }
   0xb   :  { %494 = shalt.err (!%p491_p4)
}
   0xc   :  { %s542_s12 = smov 128   ;;  %s543_s13 = smov 8  }
   0xd   :  { %26 = dma.hbm_to_vmem [thread:$0]  %s667_s0, 2048, %s21_s10, [#allocation3], %s542_s12, %s542_s12, %s543_s13  }
   0xe   :  { %535 = dma.done.wait [#allocation3], 2048  }
   0xf   :  { %536 = vsyncadd [#allocation3], 4294965248  ;;  %v567_v0 = vld [vmem:[#allocation2] sm:$0xff]  ;;  %v569_v1 = vld [vmem:[#allocation2 + $0x8] sm:$0xff]  ;;  %s544_s0 = smov [#allocation5]  }
  0x10   :  { %109 = vxpose.xlu0.b32.start [1/16] %v567_v0, 128  ;;  %v70_v2 = vadd.f32 %v569_v1, %v567_v0  ;;  %v574_v3 = vld [vmem:[#allocation2 + $0x10] sm:$0xff]  ;;  %v577_v5 = vld [vmem:[#allocation2 + $0x18] sm:$0xff]  ;;  %v583_v8 = vld [vmem:[#allocation2 + $0x20] sm:$0xff]  ;;  %s324_s16 = sshll.u32 %s544_s0, 4  ;;  %s325_s16 = int_to_ptr.vmem [resolvable:$true] %s324_s16 }
  0x11   :  { %v581_v7 = vld [vmem:[#allocation2 + $0x78] sm:$0xff]  ;;  %v588_v10 = vld [vmem:[#allocation2 + $0x70] sm:$0xff]  ;;  %v592_v11 = vld [vmem:[#allocation2 + $0x28] sm:$0xff]  ;;  %s495_s17 = scalar_lea.vmem %s325_s16, 128  ;;  %p500_p6 = scmp.lt.s32.totalorder %s325_s16, %s325_s16 }
  0x12   :  { %v71_v4 = vadd.f32 %v70_v2, %v574_v3  ;;  %381 = vmatprep.subr.mxu0 %v581_v7  ;;  %437 = vmatprep.subr.mxu1 %v581_v7  ;;  %v598_v13 = vld [vmem:[#allocation2 + $0x68] sm:$0xff]  ;;  %v59_v14 = vld [vmem:[#allocation2 + $0x30] sm:$0xff]  ;;  %v603_v16 = vld [vmem:[#allocation2 + $0x60] sm:$0xff]  ;;  %p496_p5 = scmp.ne.s32.totalorder %s325_s16, %s495_s17  ;;  %p501_p7 = scmp.lt.s32.totalorder %s495_s17, %s495_s17 }
  0x13   :  { %382 = vmatpush3.msra.mxu0 %v581_v7  ;;  %453 = vmatpush3.msra.mxu1 %v581_v7  ;;  %v60_v17 = vld [vmem:[#allocation2 + $0x38] sm:$0xff]  ;;  %v61_v20 = vld [vmem:[#allocation2 + $0x40] sm:$0xff]  ;;  %v63_v22 = vld [vmem:[#allocation2 + $0x50] sm:$0xff] }
  0x14   :  { %110 = vxpose.xlu0.b32.cont [2/16] %v569_v1, 128  ;;  %v72_v6 = vadd.f32 %v71_v4, %v577_v5  ;;  %383 = vmatprep.subr.mxu0 %v588_v10  ;;  %v610_v19 = vld [vmem:[#allocation2 + $0x58] sm:$0xff]  ;;  %v62_v23 = vld [vmem:[#allocation2 + $0x48] sm:$0xff]  ;;  %p502_p8 = por %p501_p7, %p500_p6 }
  0x15   :  { %438 = vmatprep.subr.mxu1 %v588_v10  ;;  %384 = vmatpush3.msra.mxu0 %v588_v10 }
  0x16   :  { %v73_v9 = vadd.f32 %v72_v6, %v583_v8  ;;  %385 = vmatprep.subr.mxu0 %v598_v13  ;;  %454 = vmatpush3.msra.mxu1 %v588_v10  ;;  %p503_p9 = pnand %p502_p8, %p496_p5 }
  0x17   :  { %386 = vmatpush3.msra.mxu0 %v598_v13  ;;  %439 = vmatprep.subr.mxu1 %v598_v13 }
  0x18   :  { %111 = vxpose.xlu0.b32.cont [3/16] %v574_v3, 128  ;;  %v74_v12 = vadd.f32 %v73_v9, %v592_v11  ;;  %387 = vmatprep.subr.mxu0 %v603_v16 }
  0x19   :  { %455 = vmatpush3.msra.mxu1 %v598_v13  ;;  %388 = vmatpush3.msra.mxu0 %v603_v16 }
  0x1a   :  { %v75_v15 = vadd.f32 %v74_v12, %v59_v14  ;;  %389 = vmatprep.subr.mxu0 %v610_v19  ;;  %440 = vmatprep.subr.mxu1 %v603_v16 }
  0x1b   :  { %390 = vmatpush3.msra.mxu0 %v610_v19  ;;  %456 = vmatpush3.msra.mxu1 %v603_v16 }
  0x1c   :  { %112 = vxpose.xlu0.b32.cont [4/16] %v577_v5, 128  ;;  %v76_v18 = vadd.f32 %v75_v15, %v60_v17  ;;  %391 = vmatprep.subr.mxu0 %v63_v22 }
  0x1d   :  { %441 = vmatprep.subr.mxu1 %v610_v19  ;;  %392 = vmatpush3.msra.mxu0 %v63_v22 }
  0x1e   :  { %v77_v21 = vadd.f32 %v76_v18, %v61_v20  ;;  %393 = vmatprep.subr.mxu0 %v62_v23  ;;  %457 = vmatpush3.msra.mxu1 %v610_v19 }
  0x1f   :  { %394 = vmatpush3.msra.mxu0 %v62_v23  ;;  %442 = vmatprep.subr.mxu1 %v63_v22 }
  0x20   :  { %113 = vxpose.xlu0.b32.cont [5/16] %v583_v8, 128  ;;  %v78_v24 = vadd.f32 %v77_v21, %v62_v23  ;;  %395 = vmatprep.subr.mxu0 %v61_v20 }
  0x21   :  { %458 = vmatpush3.msra.mxu1 %v63_v22  ;;  %396 = vmatpush3.msra.mxu0 %v61_v20 }
  0x22   :  { %v79_v25 = vadd.f32 %v78_v24, %v63_v22  ;;  %397 = vmatprep.subr.mxu0 %v60_v17  ;;  %443 = vmatprep.subr.mxu1 %v62_v23 }
  0x23   :  { %398 = vmatpush3.msra.mxu0 %v60_v17  ;;  %459 = vmatpush3.msra.mxu1 %v62_v23 }
  0x24   :  { %114 = vxpose.xlu0.b32.cont [6/16] %v592_v11, 128  ;;  %v80_v26 = vadd.f32 %v79_v25, %v610_v19  ;;  %399 = vmatprep.subr.mxu0 %v59_v14 }
  0x25   :  { %444 = vmatprep.subr.mxu1 %v61_v20  ;;  %400 = vmatpush3.msra.mxu0 %v59_v14 }
  0x26   :  { %v81_v27 = vadd.f32 %v80_v26, %v603_v16  ;;  %401 = vmatprep.subr.mxu0 %v592_v11  ;;  %460 = vmatpush3.msra.mxu1 %v61_v20 }
  0x27   :  { %402 = vmatpush3.msra.mxu0 %v592_v11  ;;  %445 = vmatprep.subr.mxu1 %v60_v17 }
  0x28   :  { %115 = vxpose.xlu0.b32.cont [7/16] %v59_v14, 128  ;;  %v624_v28 = vadd.f32 %v81_v27, %v598_v13  ;;  %403 = vmatprep.subr.mxu0 %v583_v8 }
  0x29   :  { %461 = vmatpush3.msra.mxu1 %v60_v17  ;;  %404 = vmatpush3.msra.mxu0 %v583_v8 }
  0x2a   :  { %405 = vmatprep.subr.mxu0 %v577_v5  ;;  %446 = vmatprep.subr.mxu1 %v59_v14  ;;  %v83_v45 = vadd.f32 %v624_v28, %v588_v10 }
  0x2b   :  { %406 = vmatpush3.msra.mxu0 %v577_v5  ;;  %462 = vmatpush3.msra.mxu1 %v59_v14 }
  0x2c   :  { %116 = vxpose.xlu0.b32.cont [8/16] %v60_v17, 128  ;;  %407 = vmatprep.subr.mxu0 %v574_v3  ;;  %v84_v46 = vadd.f32 %v83_v45, %v581_v7 }
  0x2d   :  { %447 = vmatprep.subr.mxu1 %v592_v11  ;;  %408 = vmatpush3.msra.mxu0 %v574_v3 }
  0x2e   :  { %409 = vmatprep.subr.mxu0 %v569_v1  ;;  %463 = vmatpush3.msra.mxu1 %v592_v11  ;;  %v85_v47 = vrot.slane %v84_v46, 4 }
  0x2f   :  { %410 = vmatpush3.msra.mxu0 %v569_v1  ;;  %448 = vmatprep.subr.mxu1 %v583_v8 }
  0x30   :  { %117 = vxpose.xlu0.b32.cont [9/16] %v61_v20, 128  ;;  %411 = vmatprep.subr.mxu0 %v567_v0  ;;  %v86_v48 = vadd.f32 %v85_v47, %v84_v46 }
  0x31   :  { %464 = vmatpush3.msra.mxu1 %v583_v8  ;;  %412 = vmatpush3.msra.mxu0 %v567_v0 }
  0x32   :  { %449 = vmatprep.subr.mxu1 %v577_v5  ;;  %v87_v49 = vrot.slane %v86_v48, 2 }
  0x33   :  { %465 = vmatpush3.msra.mxu1 %v577_v5 }
  0x34   :  { %118 = vxpose.xlu0.b32.cont [10/16] %v62_v23, 128  ;;  %450 = vmatprep.subr.mxu1 %v574_v3  ;;  %v88_v50 = vadd.f32 %v87_v49, %v86_v48 }
  0x35   :  { %466 = vmatpush3.msra.mxu1 %v574_v3 }
  0x36   :  { %451 = vmatprep.subr.mxu1 %v569_v1  ;;  %v89_v51 = vrot.slane %v88_v50, 1 }
  0x37   :  { %467 = vmatpush3.msra.mxu1 %v569_v1 }
  0x38   :  { %119 = vxpose.xlu0.b32.cont [11/16] %v63_v22, 128  ;;  %452 = vmatprep.subr.mxu1 %v567_v0  ;;  %v90_v52 = vadd.f32 %v89_v51, %v88_v50 }
  0x39   :  { %468 = vmatpush3.msra.mxu1 %v567_v0 }
  0x3a   :  { %92 = vst [vmem:[#allocation5] sm:$0xff] %v90_v52 }
  0x3c   :  { %120 = vxpose.xlu0.b32.cont [12/16] %v610_v19, 128 }
  0x40   :  { %121 = vxpose.xlu0.b32.cont [13/16] %v603_v16, 128 }
  0x44   :  { %122 = vxpose.xlu0.b32.cont [14/16] %v598_v13, 128 }
  0x48   :  { %123 = vxpose.xlu0.b32.cont [15/16] %v588_v10, 128 }
  0x4c   :  { %124 = vxpose.xlu0.b32.end [16/16] %v581_v7, 128 }
  0x8c   :  { %v125_v29 = vpop.trf.xlu0 }
  0x8d   :  { %413 = vmatprep.mubr.f32.mxu0 %v125_v29 }
  0x90   :  { %v126_v30 = vpop.trf.xlu0 }
  0x91   :  { %414 = vmatmul.mubr.f32.vlgmr.msra.gmra.mxu0 %v126_v30 }
  0x94   :  { %v127_v31 = vpop.trf.xlu0 }
  0x95   :  { %416 = vmatprep.mubr.f32.mxu0 %v127_v31 }
  0x98   :  { %v128_v32 = vpop.trf.xlu0 }
  0x99   :  { %417 = vmatmul.mubr.f32.gmra.mxu0 %v128_v32 }
  0x9c   :  { %v129_v33 = vpop.trf.xlu0 }
  0x9d   :  { %419 = vmatprep.mubr.f32.mxu0 %v129_v33 }
  0xa0   :  { %v130_v34 = vpop.trf.xlu0 }
  0xa1   :  { %420 = vmatmul.mubr.f32.gmra.mxu0 %v130_v34 }
  0xa4   :  { %v131_v35 = vpop.trf.xlu0 }
  0xa5   :  { %422 = vmatprep.mubr.f32.mxu0 %v131_v35 }
  0xa8   :  { %v132_v36 = vpop.trf.xlu0 }
  0xa9   :  { %423 = vmatmul.mubr.f32.gmra.mxu0 %v132_v36 }
  0xac   :  { %v133_v37 = vpop.trf.xlu0 }
  0xad   :  { %425 = vmatprep.mubr.f32.mxu1 %v133_v37 }
  0xb0   :  { %v134_v38 = vpop.trf.xlu0 }
  0xb1   :  { %426 = vmatmul.mubr.f32.vlgmr.msra.gmra.mxu1 %v134_v38 }
  0xb4   :  { %v135_v39 = vpop.trf.xlu0 }
  0xb5   :  { %428 = vmatprep.mubr.f32.mxu1 %v135_v39 }
  0xb8   :  { %v136_v40 = vpop.trf.xlu0 }
  0xb9   :  { %429 = vmatmul.mubr.f32.gmra.mxu1 %v136_v40 }
  0xbc   :  { %v137_v41 = vpop.trf.xlu0 }
  0xbd   :  { %431 = vmatprep.mubr.f32.mxu1 %v137_v41 }
  0xc0   :  { %v138_v42 = vpop.trf.xlu0 }
  0xc1   :  { %432 = vmatmul.mubr.f32.gmra.mxu1 %v138_v42 }
  0xc4   :  { %v139_v43 = vpop.trf.xlu0 }
  0xc5   :  { %434 = vmatprep.mubr.f32.mxu1 %v139_v43 }
  0xc8   :  { %v140_v44 = vpop.trf.xlu0 }
  0xc9   :  { %435 = vmatmul.mubr.f32.gmra.mxu1 %v140_v44 }
  0xca   :  { %506 = shalt.err (!%p503_p9)
}
  0xcb   :  { %327 = dma.vmem_to_hbm [thread:$0]  %s325_s16, 128, %s668_s1, [#allocation4]  }
  0xcc   :  { %s545_s1 = smov [#allocation6]  }
  0xcd   :  { %s333_s20 = sshll.u32 %s545_s1, 4  ;;  %s334_s20 = int_to_ptr.vmem [resolvable:$true] %s333_s20 }
  0xce   :  { %s515_s21 = scalar_lea.vmem %s334_s20, 2048  ;;  %p520_p11 = scmp.lt.s32.totalorder %s334_s20, %s334_s20 }
  0xcf   :  { %p516_p10 = scmp.ne.s32.totalorder %s334_s20, %s515_s21  ;;  %p521_p12 = scmp.lt.s32.totalorder %s515_s21, %s515_s21 }
  0xd1   :  { %p522_p13 = por %p521_p12, %p520_p11 }
  0xd3   :  { %p523_p0 = pnand %p522_p13, %p516_p10 }
 0x151   :  { %v415_v53 = vpop.f32.mrf.mxu0 }
 0x152   :  { %303 = vst [vmem:[#allocation6 + $0x8] sm:$0xff] %v415_v53 }
 0x153   :  { %v207_v54 = vpop.f32.mrf.mxu0 }
 0x154   :  { %302 = vst [vmem:[#allocation6] sm:$0xff] %v207_v54 }
 0x159   :  { %v418_v55 = vpop.f32.mrf.mxu0 }
 0x15a   :  { %305 = vst [vmem:[#allocation6 + $0x18] sm:$0xff] %v418_v55 }
 0x15b   :  { %v217_v56 = vpop.f32.mrf.mxu0 }
 0x15c   :  { %304 = vst [vmem:[#allocation6 + $0x10] sm:$0xff] %v217_v56 }
 0x161   :  { %v421_v57 = vpop.f32.mrf.mxu0 }
 0x162   :  { %307 = vst [vmem:[#allocation6 + $0x28] sm:$0xff] %v421_v57 }
 0x163   :  { %v227_v58 = vpop.f32.mrf.mxu0 }
 0x164   :  { %306 = vst [vmem:[#allocation6 + $0x20] sm:$0xff] %v227_v58 }
 0x169   :  { %v424_v59 = vpop.f32.mrf.mxu0 }
 0x16a   :  { %309 = vst [vmem:[#allocation6 + $0x38] sm:$0xff] %v424_v59 }
 0x16b   :  { %v237_v60 = vpop.f32.mrf.mxu0 }
 0x16c   :  { %308 = vst [vmem:[#allocation6 + $0x30] sm:$0xff] %v237_v60 }
 0x171   :  { %v427_v61 = vpop.f32.mrf.mxu1 }
 0x172   :  { %311 = vst [vmem:[#allocation6 + $0x48] sm:$0xff] %v427_v61 }
 0x173   :  { %v247_v62 = vpop.f32.mrf.mxu1 }
 0x174   :  { %310 = vst [vmem:[#allocation6 + $0x40] sm:$0xff] %v247_v62 }
 0x179   :  { %v430_v63 = vpop.f32.mrf.mxu1 }
 0x17a   :  { %313 = vst [vmem:[#allocation6 + $0x58] sm:$0xff] %v430_v63 }
 0x17b   :  { %v257_v0 = vpop.f32.mrf.mxu1 }
 0x17c   :  { %312 = vst [vmem:[#allocation6 + $0x50] sm:$0xff] %v257_v0 }
 0x181   :  { %v433_v1 = vpop.f32.mrf.mxu1 }
 0x182   :  { %315 = vst [vmem:[#allocation6 + $0x68] sm:$0xff] %v433_v1 }
 0x183   :  { %v267_v2 = vpop.f32.mrf.mxu1 }
 0x184   :  { %314 = vst [vmem:[#allocation6 + $0x60] sm:$0xff] %v267_v2 }
 0x189   :  { %v436_v3 = vpop.f32.mrf.mxu1 }
 0x18a   :  { %317 = vst [vmem:[#allocation6 + $0x78] sm:$0xff] %v436_v3 }
 0x18b   :  { %v277_v4 = vpop.f32.mrf.mxu1 }
 0x18c   :  { %316 = vst [vmem:[#allocation6 + $0x70] sm:$0xff] %v277_v4 }
 0x18d   :  { %526 = shalt.err (!%p523_p0)
}
 0x18e   :  { %339 = dma.vmem_to_hbm [thread:$0]  %s334_s20, 2048, %s669_s2, [#allocation7], %s542_s12, %s542_s12, %s543_s13  }
 0x18f   :  { %537 = dma.done.wait [#allocation4], 128  }
 0x190   :  { %538 = vsyncadd [#allocation4], 4294967168 }
 0x191   :  { %539 = dma.done.wait [#allocation7], 2048  }
 0x192   :  { %540 = vsyncadd [#allocation7], 4294965248 }
 0x193   :  { %346 = vsyncpa [#allocation3], 1 }
 0x194   :  { %347 = vsyncpa [#allocation4], 1 }
 0x195   :  { %348 = vsyncpa [#allocation7], 1 }

</bundles_post_ra>
